<compile_context>
chip_gen: v5e
topology: v5e:2x2
jax: 0.10.0
libtpu: 0.0.40
codegen_flags: <defaults>
</compile_context>

<pallas_src>
import jax
import jax.numpy as jnp
from jax.experimental import pallas as pl
from jax.experimental.pallas import tpu as pltpu


# ----------------------------------------------------------------------------
# Fused kernel
# ----------------------------------------------------------------------------
def _make_basic_block_kernel(H, W, NB, Cin, Cout):
    HW = H * W
    L = NB * HW
    # Tap t = dy*3+dx reads the input at flat offset (dy-1)*W + (dx-1); realized
    # as a circular roll by -offset on the lane axis.  Wrapped (out-of-image /
    # cross-image) reads are zeroed by the per-tap boundary mask.
    shifts = [(-((dy - 1) * W + (dx - 1))) % L for dy in range(3) for dx in range(3)]

    def kernel(x_ref, w1_ref, b1_ref, w2_ref, b2_ref, mask_ref, o_ref, patch_ref):
        """Fused BasicBlock for one lane-stacked slab of NB images.

        x_ref    : (1, Cin, L)      f32  input slab (channels x stacked H*W)
        w1_ref   : (Cout, 9*Cin)    bf16 conv1 weights, BN1 scale folded in
        b1_ref   : (Cout, 1)        f32  folded BN1 bias
        w2_ref   : (Cout, 9*Cout)   bf16 conv2 weights, BN2 scale folded in
        b2_ref   : (Cout, 1)        f32  folded BN2 bias
        mask_ref : (9, 1, L)        f32  per-tap boundary (halo) masks
        o_ref    : (1, Cout, L)     f32
        patch_ref: (9*Cin, L)       f32  scratch: stacked-tap conv operand
        """
        x = x_ref[0]              # (Cin, L) f32 -- also the residual
        masks = mask_ref[...]     # (9, 1, L) f32

        def conv3x3_bn(inp, w_ref, b_ref, c):
            # Assemble the 9-tap stacked patch (9*c, L): roll (XLU) + mask (VPU)
            # + static-slice store into scratch.  Center tap needs no roll/mask.
            for t, s in enumerate(shifts):
                tap = inp if s == 0 else pltpu.roll(inp, shift=s, axis=1) * masks[t]
                patch_ref[pl.ds(t * c, c), :] = tap
            # Single bf16 cast at the matmul boundary, single K=9*c MXU matmul
            # with f32 accumulation, plus the folded BN bias.
            patch = patch_ref[...].astype(jnp.bfloat16)
            return jnp.dot(w_ref[...], patch,
                           preferred_element_type=jnp.float32) + b_ref[...]

        h = jnp.maximum(conv3x3_bn(x, w1_ref, b1_ref, Cin), 0.0)   # conv1+bn1+relu
        out = conv3x3_bn(h, w2_ref, b2_ref, Cout) + x              # conv2+bn2+residual
        o_ref[0] = jnp.maximum(out, 0.0).astype(o_ref.dtype)       # final relu

    return kernel


# ----------------------------------------------------------------------------
# Wrapper glue (BN folding, weight layout, boundary masks, batch->lane stacking)
# ----------------------------------------------------------------------------
def _fold_bn(gamma, beta, mean, var, eps=1e-5):
    scale = gamma / jnp.sqrt(var + eps)
    bias = beta - mean * scale
    return scale, bias


def _prep_weight(w_oihw, bn_scale):
    """torch (Cout,Cin,3,3) -> (Cout, 9*Cin) bf16, BN scale folded.

    K order is tap-major, channel-minor: column (dy*3+dx)*Cin + i, matching the
    stacked-patch layout built in the kernel.
    """
    w = w_oihw * bn_scale[:, None, None, None]       # fold BN scale per out-chan
    w = jnp.transpose(w, (0, 2, 3, 1))               # (Cout, kh, kw, Cin)
    return w.reshape(w.shape[0], -1).astype(jnp.bfloat16)


def _make_tap_masks(H, W, NB):
    """(9, 1, NB*H*W) f32: 1 where the tap's input read is inside its image."""
    y = jnp.arange(H, dtype=jnp.int32)[:, None]
    x = jnp.arange(W, dtype=jnp.int32)[None, :]
    masks = []
    for dy in range(3):
        for dx in range(3):
            ok = ((y + dy - 1 >= 0) & (y + dy - 1 < H) &
                  (x + dx - 1 >= 0) & (x + dx - 1 < W))
            m = ok.astype(jnp.float32).reshape(1, H * W)
            masks.append(jnp.tile(m, (1, NB)))       # tile per image in the slab
    return jnp.stack(masks, axis=0)


def _basic_block_pallas(x_slab, w1, b1, w2, b2, mask, *, H, W, NB):
    G, Cin, L = x_slab.shape
    Cout = w1.shape[0]

    return pl.pallas_call(
        _make_basic_block_kernel(H, W, NB, Cin, Cout),
        out_shape=jax.ShapeDtypeStruct((G, Cout, L), x_slab.dtype),
        grid=(G,),
        in_specs=[
            pl.BlockSpec((1, Cin, L), lambda g: (g, 0, 0)),      # x slab
            pl.BlockSpec((Cout, 9 * Cin), lambda g: (0, 0)),     # w1 (flattened K)
            pl.BlockSpec((Cout, 1), lambda g: (0, 0)),           # b1
            pl.BlockSpec((Cout, 9 * Cout), lambda g: (0, 0)),    # w2 (flattened K)
            pl.BlockSpec((Cout, 1), lambda g: (0, 0)),           # b2
            pl.BlockSpec((9, 1, L), lambda g: (0, 0, 0)),        # tap masks
        ],
        out_specs=pl.BlockSpec((1, Cout, L), lambda g: (g, 0, 0)),
        scratch_shapes=[pltpu.VMEM((9 * Cin, L), jnp.float32)],  # stacked patch
        compiler_params=pltpu.CompilerParams(
            dimension_semantics=("parallel",),                   # one slab per TC on v7x
        ),
    )(x_slab, w1, b1, w2, b2, mask)


@jax.jit
def basic_block_forward(x_nchw, params):
    """BasicBlock forward (stride=1, downsample=None). Input/output NCHW f32."""
    N, C, H, W = x_nchw.shape
    HW = H * W
    # One slab per TensorCore on v7x; on v5e/v6e this is just 2 cheap grid steps.
    G = 2 if (N >= 2 and N % 2 == 0) else 1
    NB = N // G
    L = NB * HW

    s1, b1 = _fold_bn(params["bn1_gamma"], params["bn1_beta"],
                      params["bn1_mean"], params["bn1_var"])
    s2, b2 = _fold_bn(params["bn2_gamma"], params["bn2_beta"],
                      params["bn2_mean"], params["bn2_var"])

    w1 = _prep_weight(params["conv1_w"], s1)   # (Cout, 9*Cin)  bf16
    w2 = _prep_weight(params["conv2_w"], s2)   # (Cout, 9*Cout) bf16
    mask = _make_tap_masks(H, W, NB)

    # (N,C,H,W) -> (G, C, NB*HW): batch collapsed into the lane axis per slab.
    x_slab = (x_nchw.reshape(G, NB, C, HW)
              .transpose(0, 2, 1, 3)
              .reshape(G, C, L))

    out = _basic_block_pallas(x_slab, w1, b1.reshape(-1, 1),
                              w2, b2.reshape(-1, 1), mask, H=H, W=W, NB=NB)

    # (G, Cout, NB*HW) -> (N, Cout, H, W)
    return (out.reshape(G, C, NB, HW)
            .transpose(0, 2, 1, 3)
            .reshape(N, C, H, W))


# ----------------------------------------------------------------------------
# Pure-JAX reference (f32) for sanity check
# ----------------------------------------------------------------------------
def _ref_forward(x_nchw, params):
    def conv(x, w):
        return jax.lax.conv_general_dilated(
            x, w, window_strides=(1, 1), padding=((1, 1), (1, 1)),
            dimension_numbers=("NCHW", "OIHW", "NCHW"))

    def bn(x, g, b, m, v, eps=1e-5):
        g = g[None, :, None, None]
        b = b[None, :, None, None]
        m = m[None, :, None, None]
        v = v[None, :, None, None]
        return (x - m) / jnp.sqrt(v + eps) * g + b

    out = conv(x_nchw, params["conv1_w"])
    out = bn(out, params["bn1_gamma"], params["bn1_beta"],
             params["bn1_mean"], params["bn1_var"])
    out = jnp.maximum(out, 0.0)
    out = conv(out, params["conv2_w"])
    out = bn(out, params["bn2_gamma"], params["bn2_beta"],
             params["bn2_mean"], params["bn2_var"])
    out = out + x_nchw
    return jnp.maximum(out, 0.0)


# ----------------------------------------------------------------------------
# Main
# ----------------------------------------------------------------------------
if __name__ == "__main__":
    key = jax.random.PRNGKey(0)
    N, C, H, W = 2, 4, 16, 16      # inplanes == planes == 4, stride=1
    planes = C

    k_x, k_w1, k_w2, k_g1, k_b1, k_g2, k_b2, k_m1, k_v1, k_m2, k_v2 = (
        jax.random.split(key, 11))

    x = jax.random.normal(k_x, (N, C, H, W), dtype=jnp.float32)

    fan_in = C * 3 * 3
    std = (2.0 / fan_in) ** 0.5  # kaiming-normal-like, deterministic
    params = {
        "conv1_w": std * jax.random.normal(k_w1, (planes, C, 3, 3), jnp.float32),
        "conv2_w": std * jax.random.normal(k_w2, (planes, planes, 3, 3), jnp.float32),
        "bn1_gamma": 1.0 + 0.1 * jax.random.normal(k_g1, (planes,), jnp.float32),
        "bn1_beta": 0.1 * jax.random.normal(k_b1, (planes,), jnp.float32),
        "bn1_mean": 0.1 * jax.random.normal(k_m1, (planes,), jnp.float32),
        "bn1_var": 1.0 + 0.1 * jax.random.uniform(k_v1, (planes,), jnp.float32),
        "bn2_gamma": 1.0 + 0.1 * jax.random.normal(k_g2, (planes,), jnp.float32),
        "bn2_beta": 0.1 * jax.random.normal(k_b2, (planes,), jnp.float32),
        "bn2_mean": 0.1 * jax.random.normal(k_m2, (planes,), jnp.float32),
        "bn2_var": 1.0 + 0.1 * jax.random.uniform(k_v2, (planes,), jnp.float32),
    }

    out = jax.block_until_ready(basic_block_forward(x, params))
    ref = jax.block_until_ready(_ref_forward(x, params))

    assert out.shape == (N, planes, H, W)
    # bf16 MXU operands (f32 accumulation) -> loosened tolerance vs f32 reference.
    max_err = float(jnp.max(jnp.abs(out - ref)))
    assert jnp.allclose(out, ref, atol=7.5e-2, rtol=5e-2), max_err

    print("KERNEL_OK")
</pallas_src>

<mosaic_0001>
module attributes {stable_mosaic.version = 11 : i64} {
  func.func @kernel(%arg0: i32, %arg1: memref<1x4x256xf32, #tpu.memory_space<vmem>>, %arg2: memref<4x36xbf16, #tpu.memory_space<vmem>>, %arg3: memref<4x1xf32, #tpu.memory_space<vmem>>, %arg4: memref<4x36xbf16, #tpu.memory_space<vmem>>, %arg5: memref<4x1xf32, #tpu.memory_space<vmem>>, %arg6: memref<9x1x256xf32, #tpu.memory_space<vmem>>, %arg7: memref<1x4x256xf32, #tpu.memory_space<vmem>>, %arg8: memref<36x256xf32, #tpu.memory_space<vmem>>) attributes {dimension_semantics = [#tpu.dimension_semantics<parallel>], iteration_bounds = array<i64: 2>, scalar_prefetch = 0 : i64, scratch_operands = 1 : i64, tpu.core_type = #tpu.core_type<tc>, window_params = [{transform_indices = @transform_0, window_bounds = array<i64: 1, 4, 256>}, {pipeline_mode = #tpu.pipeline_mode<synchronous>, transform_indices = @transform_1, window_bounds = array<i64: 4, 36>}, {pipeline_mode = #tpu.pipeline_mode<synchronous>, transform_indices = @transform_2, window_bounds = array<i64: 4, 1>}, {pipeline_mode = #tpu.pipeline_mode<synchronous>, transform_indices = @transform_3, window_bounds = array<i64: 4, 36>}, {pipeline_mode = #tpu.pipeline_mode<synchronous>, transform_indices = @transform_4, window_bounds = array<i64: 4, 1>}, {pipeline_mode = #tpu.pipeline_mode<synchronous>, transform_indices = @transform_5, window_bounds = array<i64: 9, 1, 256>}, {transform_indices = @transform_6, window_bounds = array<i64: 1, 4, 256>}]} {
    %c0 = arith.constant 0 : index
    %c0_0 = arith.constant 0 : index
    %c0_1 = arith.constant 0 : index
    %0 = vector.load %arg1[%c0, %c0_0, %c0_1] : memref<1x4x256xf32, #tpu.memory_space<vmem>>, vector<1x4x256xf32>
    %1 = vector.shape_cast %0 : vector<1x4x256xf32> to vector<4x256xf32>
    %c0_2 = arith.constant 0 : index
    %c0_3 = arith.constant 0 : index
    %c0_4 = arith.constant 0 : index
    %2 = vector.load %arg6[%c0_2, %c0_3, %c0_4] : memref<9x1x256xf32, #tpu.memory_space<vmem>>, vector<9x1x256xf32>
    %c17_i32 = arith.constant 17 : i32
    %3 = tpu.dynamic_rotate %1 by %c17_i32 dim 1 : vector<4x256xf32>, i32 -> vector<4x256xf32>
    %4 = vector.extract_strided_slice %2 {offsets = [0, 0, 0], sizes = [1, 1, 256], strides = [1, 1, 1]} : vector<9x1x256xf32> to vector<1x1x256xf32>
    %5 = vector.shape_cast %4 : vector<1x1x256xf32> to vector<1x256xf32>
    %6 = vector.broadcast %5 : vector<1x256xf32> to vector<4x256xf32>
    %7 = arith.mulf %3, %6 : vector<4x256xf32>
    %c0_5 = arith.constant 0 : index
    %c0_6 = arith.constant 0 : index
    %8 = vector.load %arg8[%c0_5, %c0_6] : memref<36x256xf32, #tpu.memory_space<vmem>>, vector<4x256xf32>
    tpu.vector_store %arg8[%c0_5, %c0_6], %7 {strides = array<i32>} : memref<36x256xf32, #tpu.memory_space<vmem>>, vector<4x256xf32>,
    %c16_i32 = arith.constant 16 : i32
    %9 = tpu.dynamic_rotate %1 by %c16_i32 dim 1 : vector<4x256xf32>, i32 -> vector<4x256xf32>
    %10 = vector.extract_strided_slice %2 {offsets = [1, 0, 0], sizes = [1, 1, 256], strides = [1, 1, 1]} : vector<9x1x256xf32> to vector<1x1x256xf32>
    %11 = vector.shape_cast %10 : vector<1x1x256xf32> to vector<1x256xf32>
    %12 = vector.broadcast %11 : vector<1x256xf32> to vector<4x256xf32>
    %13 = arith.mulf %9, %12 : vector<4x256xf32>
    %c4 = arith.constant 4 : index
    %c0_7 = arith.constant 0 : index
    %14 = vector.load %arg8[%c4, %c0_7] : memref<36x256xf32, #tpu.memory_space<vmem>>, vector<4x256xf32>
    tpu.vector_store %arg8[%c4, %c0_7], %13 {strides = array<i32>} : memref<36x256xf32, #tpu.memory_space<vmem>>, vector<4x256xf32>,
    %c15_i32 = arith.constant 15 : i32
    %15 = tpu.dynamic_rotate %1 by %c15_i32 dim 1 : vector<4x256xf32>, i32 -> vector<4x256xf32>
    %16 = vector.extract_strided_slice %2 {offsets = [2, 0, 0], sizes = [1, 1, 256], strides = [1, 1, 1]} : vector<9x1x256xf32> to vector<1x1x256xf32>
    %17 = vector.shape_cast %16 : vector<1x1x256xf32> to vector<1x256xf32>
    %18 = vector.broadcast %17 : vector<1x256xf32> to vector<4x256xf32>
    %19 = arith.mulf %15, %18 : vector<4x256xf32>
    %c8 = arith.constant 8 : index
    %c0_8 = arith.constant 0 : index
    %20 = vector.load %arg8[%c8, %c0_8] : memref<36x256xf32, #tpu.memory_space<vmem>>, vector<4x256xf32>
    tpu.vector_store %arg8[%c8, %c0_8], %19 {strides = array<i32>} : memref<36x256xf32, #tpu.memory_space<vmem>>, vector<4x256xf32>,
    %c1_i32 = arith.constant 1 : i32
    %21 = tpu.dynamic_rotate %1 by %c1_i32 dim 1 : vector<4x256xf32>, i32 -> vector<4x256xf32>
    %22 = vector.extract_strided_slice %2 {offsets = [3, 0, 0], sizes = [1, 1, 256], strides = [1, 1, 1]} : vector<9x1x256xf32> to vector<1x1x256xf32>
    %23 = vector.shape_cast %22 : vector<1x1x256xf32> to vector<1x256xf32>
    %24 = vector.broadcast %23 : vector<1x256xf32> to vector<4x256xf32>
    %25 = arith.mulf %21, %24 : vector<4x256xf32>
    %c12 = arith.constant 12 : index
    %c0_9 = arith.constant 0 : index
    %26 = vector.load %arg8[%c12, %c0_9] : memref<36x256xf32, #tpu.memory_space<vmem>>, vector<4x256xf32>
    tpu.vector_store %arg8[%c12, %c0_9], %25 {strides = array<i32>} : memref<36x256xf32, #tpu.memory_space<vmem>>, vector<4x256xf32>,
    %c16 = arith.constant 16 : index
    %c0_10 = arith.constant 0 : index
    %27 = vector.load %arg8[%c16, %c0_10] : memref<36x256xf32, #tpu.memory_space<vmem>>, vector<4x256xf32>
    tpu.vector_store %arg8[%c16, %c0_10], %1 {strides = array<i32>} : memref<36x256xf32, #tpu.memory_space<vmem>>, vector<4x256xf32>,
    %c255_i32 = arith.constant 255 : i32
    %28 = tpu.dynamic_rotate %1 by %c255_i32 dim 1 : vector<4x256xf32>, i32 -> vector<4x256xf32>
    %29 = vector.extract_strided_slice %2 {offsets = [5, 0, 0], sizes = [1, 1, 256], strides = [1, 1, 1]} : vector<9x1x256xf32> to vector<1x1x256xf32>
    %30 = vector.shape_cast %29 : vector<1x1x256xf32> to vector<1x256xf32>
    %31 = vector.broadcast %30 : vector<1x256xf32> to vector<4x256xf32>
    %32 = arith.mulf %28, %31 : vector<4x256xf32>
    %c20 = arith.constant 20 : index
    %c0_11 = arith.constant 0 : index
    %33 = vector.load %arg8[%c20, %c0_11] : memref<36x256xf32, #tpu.memory_space<vmem>>, vector<4x256xf32>
    tpu.vector_store %arg8[%c20, %c0_11], %32 {strides = array<i32>} : memref<36x256xf32, #tpu.memory_space<vmem>>, vector<4x256xf32>,
    %c241_i32 = arith.constant 241 : i32
    %34 = tpu.dynamic_rotate %1 by %c241_i32 dim 1 : vector<4x256xf32>, i32 -> vector<4x256xf32>
    %35 = vector.extract_strided_slice %2 {offsets = [6, 0, 0], sizes = [1, 1, 256], strides = [1, 1, 1]} : vector<9x1x256xf32> to vector<1x1x256xf32>
    %36 = vector.shape_cast %35 : vector<1x1x256xf32> to vector<1x256xf32>
    %37 = vector.broadcast %36 : vector<1x256xf32> to vector<4x256xf32>
    %38 = arith.mulf %34, %37 : vector<4x256xf32>
    %c24 = arith.constant 24 : index
    %c0_12 = arith.constant 0 : index
    %39 = vector.load %arg8[%c24, %c0_12] : memref<36x256xf32, #tpu.memory_space<vmem>>, vector<4x256xf32>
    tpu.vector_store %arg8[%c24, %c0_12], %38 {strides = array<i32>} : memref<36x256xf32, #tpu.memory_space<vmem>>, vector<4x256xf32>,
    %c240_i32 = arith.constant 240 : i32
    %40 = tpu.dynamic_rotate %1 by %c240_i32 dim 1 : vector<4x256xf32>, i32 -> vector<4x256xf32>
    %41 = vector.extract_strided_slice %2 {offsets = [7, 0, 0], sizes = [1, 1, 256], strides = [1, 1, 1]} : vector<9x1x256xf32> to vector<1x1x256xf32>
    %42 = vector.shape_cast %41 : vector<1x1x256xf32> to vector<1x256xf32>
    %43 = vector.broadcast %42 : vector<1x256xf32> to vector<4x256xf32>
    %44 = arith.mulf %40, %43 : vector<4x256xf32>
    %c28 = arith.constant 28 : index
    %c0_13 = arith.constant 0 : index
    %45 = vector.load %arg8[%c28, %c0_13] : memref<36x256xf32, #tpu.memory_space<vmem>>, vector<4x256xf32>
    tpu.vector_store %arg8[%c28, %c0_13], %44 {strides = array<i32>} : memref<36x256xf32, #tpu.memory_space<vmem>>, vector<4x256xf32>,
    %c239_i32 = arith.constant 239 : i32
    %46 = tpu.dynamic_rotate %1 by %c239_i32 dim 1 : vector<4x256xf32>, i32 -> vector<4x256xf32>
    %47 = vector.extract_strided_slice %2 {offsets = [8, 0, 0], sizes = [1, 1, 256], strides = [1, 1, 1]} : vector<9x1x256xf32> to vector<1x1x256xf32>
    %48 = vector.shape_cast %47 : vector<1x1x256xf32> to vector<1x256xf32>
    %49 = vector.broadcast %48 : vector<1x256xf32> to vector<4x256xf32>
    %50 = arith.mulf %46, %49 : vector<4x256xf32>
    %c32 = arith.constant 32 : index
    %c0_14 = arith.constant 0 : index
    %51 = vector.load %arg8[%c32, %c0_14] : memref<36x256xf32, #tpu.memory_space<vmem>>, vector<4x256xf32>
    tpu.vector_store %arg8[%c32, %c0_14], %50 {strides = array<i32>} : memref<36x256xf32, #tpu.memory_space<vmem>>, vector<4x256xf32>,
    %c0_15 = arith.constant 0 : index
    %c0_16 = arith.constant 0 : index
    %52 = vector.load %arg8[%c0_15, %c0_16] : memref<36x256xf32, #tpu.memory_space<vmem>>, vector<36x256xf32>
    %53 = arith.truncf %52 : vector<36x256xf32> to vector<36x256xbf16>
    %c0_17 = arith.constant 0 : index
    %c0_18 = arith.constant 0 : index
    %54 = vector.load %arg2[%c0_17, %c0_18] : memref<4x36xbf16, #tpu.memory_space<vmem>>, vector<4x36xbf16>
    %cst = arith.constant dense<0.000000e+00> : vector<4x256xf32>
    %55 = tpu.matmul %54, %53, %cst {dimension_numbers = #tpu.dot_dimension_numbers<[1], [0], [0], [1], [0, 0, 1, 1], [], []>} : vector<4x36xbf16>, vector<36x256xbf16>, vector<4x256xf32> -> vector<4x256xf32>
    %c0_19 = arith.constant 0 : index
    %c0_20 = arith.constant 0 : index
    %56 = vector.load %arg3[%c0_19, %c0_20] : memref<4x1xf32, #tpu.memory_space<vmem>>, vector<4x1xf32>
    %57 = vector.broadcast %56 : vector<4x1xf32> to vector<4x256xf32>
    %58 = arith.addf %55, %57 : vector<4x256xf32>
    %cst_21 = arith.constant 0.000000e+00 : f32
    %59 = vector.broadcast %cst_21 : f32 to vector<4x256xf32>
    %60 = arith.maximumf %58, %59 : vector<4x256xf32>
    %c17_i32_22 = arith.constant 17 : i32
    %61 = tpu.dynamic_rotate %60 by %c17_i32_22 dim 1 : vector<4x256xf32>, i32 -> vector<4x256xf32>
    %62 = vector.extract_strided_slice %2 {offsets = [0, 0, 0], sizes = [1, 1, 256], strides = [1, 1, 1]} : vector<9x1x256xf32> to vector<1x1x256xf32>
    %63 = vector.shape_cast %62 : vector<1x1x256xf32> to vector<1x256xf32>
    %64 = vector.broadcast %63 : vector<1x256xf32> to vector<4x256xf32>
    %65 = arith.mulf %61, %64 : vector<4x256xf32>
    %c0_23 = arith.constant 0 : index
    %c0_24 = arith.constant 0 : index
    %66 = vector.load %arg8[%c0_23, %c0_24] : memref<36x256xf32, #tpu.memory_space<vmem>>, vector<4x256xf32>
    tpu.vector_store %arg8[%c0_23, %c0_24], %65 {strides = array<i32>} : memref<36x256xf32, #tpu.memory_space<vmem>>, vector<4x256xf32>,
    %c16_i32_25 = arith.constant 16 : i32
    %67 = tpu.dynamic_rotate %60 by %c16_i32_25 dim 1 : vector<4x256xf32>, i32 -> vector<4x256xf32>
    %68 = vector.extract_strided_slice %2 {offsets = [1, 0, 0], sizes = [1, 1, 256], strides = [1, 1, 1]} : vector<9x1x256xf32> to vector<1x1x256xf32>
    %69 = vector.shape_cast %68 : vector<1x1x256xf32> to vector<1x256xf32>
    %70 = vector.broadcast %69 : vector<1x256xf32> to vector<4x256xf32>
    %71 = arith.mulf %67, %70 : vector<4x256xf32>
    %c4_26 = arith.constant 4 : index
    %c0_27 = arith.constant 0 : index
    %72 = vector.load %arg8[%c4_26, %c0_27] : memref<36x256xf32, #tpu.memory_space<vmem>>, vector<4x256xf32>
    tpu.vector_store %arg8[%c4_26, %c0_27], %71 {strides = array<i32>} : memref<36x256xf32, #tpu.memory_space<vmem>>, vector<4x256xf32>,
    %c15_i32_28 = arith.constant 15 : i32
    %73 = tpu.dynamic_rotate %60 by %c15_i32_28 dim 1 : vector<4x256xf32>, i32 -> vector<4x256xf32>
    %74 = vector.extract_strided_slice %2 {offsets = [2, 0, 0], sizes = [1, 1, 256], strides = [1, 1, 1]} : vector<9x1x256xf32> to vector<1x1x256xf32>
    %75 = vector.shape_cast %74 : vector<1x1x256xf32> to vector<1x256xf32>
    %76 = vector.broadcast %75 : vector<1x256xf32> to vector<4x256xf32>
    %77 = arith.mulf %73, %76 : vector<4x256xf32>
    %c8_29 = arith.constant 8 : index
    %c0_30 = arith.constant 0 : index
    %78 = vector.load %arg8[%c8_29, %c0_30] : memref<36x256xf32, #tpu.memory_space<vmem>>, vector<4x256xf32>
    tpu.vector_store %arg8[%c8_29, %c0_30], %77 {strides = array<i32>} : memref<36x256xf32, #tpu.memory_space<vmem>>, vector<4x256xf32>,
    %c1_i32_31 = arith.constant 1 : i32
    %79 = tpu.dynamic_rotate %60 by %c1_i32_31 dim 1 : vector<4x256xf32>, i32 -> vector<4x256xf32>
    %80 = vector.extract_strided_slice %2 {offsets = [3, 0, 0], sizes = [1, 1, 256], strides = [1, 1, 1]} : vector<9x1x256xf32> to vector<1x1x256xf32>
    %81 = vector.shape_cast %80 : vector<1x1x256xf32> to vector<1x256xf32>
    %82 = vector.broadcast %81 : vector<1x256xf32> to vector<4x256xf32>
    %83 = arith.mulf %79, %82 : vector<4x256xf32>
    %c12_32 = arith.constant 12 : index
    %c0_33 = arith.constant 0 : index
    %84 = vector.load %arg8[%c12_32, %c0_33] : memref<36x256xf32, #tpu.memory_space<vmem>>, vector<4x256xf32>
    tpu.vector_store %arg8[%c12_32, %c0_33], %83 {strides = array<i32>} : memref<36x256xf32, #tpu.memory_space<vmem>>, vector<4x256xf32>,
    %c16_34 = arith.constant 16 : index
    %c0_35 = arith.constant 0 : index
    %85 = vector.load %arg8[%c16_34, %c0_35] : memref<36x256xf32, #tpu.memory_space<vmem>>, vector<4x256xf32>
    tpu.vector_store %arg8[%c16_34, %c0_35], %60 {strides = array<i32>} : memref<36x256xf32, #tpu.memory_space<vmem>>, vector<4x256xf32>,
    %c255_i32_36 = arith.constant 255 : i32
    %86 = tpu.dynamic_rotate %60 by %c255_i32_36 dim 1 : vector<4x256xf32>, i32 -> vector<4x256xf32>
    %87 = vector.extract_strided_slice %2 {offsets = [5, 0, 0], sizes = [1, 1, 256], strides = [1, 1, 1]} : vector<9x1x256xf32> to vector<1x1x256xf32>
    %88 = vector.shape_cast %87 : vector<1x1x256xf32> to vector<1x256xf32>
    %89 = vector.broadcast %88 : vector<1x256xf32> to vector<4x256xf32>
    %90 = arith.mulf %86, %89 : vector<4x256xf32>
    %c20_37 = arith.constant 20 : index
    %c0_38 = arith.constant 0 : index
    %91 = vector.load %arg8[%c20_37, %c0_38] : memref<36x256xf32, #tpu.memory_space<vmem>>, vector<4x256xf32>
    tpu.vector_store %arg8[%c20_37, %c0_38], %90 {strides = array<i32>} : memref<36x256xf32, #tpu.memory_space<vmem>>, vector<4x256xf32>,
    %c241_i32_39 = arith.constant 241 : i32
    %92 = tpu.dynamic_rotate %60 by %c241_i32_39 dim 1 : vector<4x256xf32>, i32 -> vector<4x256xf32>
    %93 = vector.extract_strided_slice %2 {offsets = [6, 0, 0], sizes = [1, 1, 256], strides = [1, 1, 1]} : vector<9x1x256xf32> to vector<1x1x256xf32>
    %94 = vector.shape_cast %93 : vector<1x1x256xf32> to vector<1x256xf32>
    %95 = vector.broadcast %94 : vector<1x256xf32> to vector<4x256xf32>
    %96 = arith.mulf %92, %95 : vector<4x256xf32>
    %c24_40 = arith.constant 24 : index
    %c0_41 = arith.constant 0 : index
    %97 = vector.load %arg8[%c24_40, %c0_41] : memref<36x256xf32, #tpu.memory_space<vmem>>, vector<4x256xf32>
    tpu.vector_store %arg8[%c24_40, %c0_41], %96 {strides = array<i32>} : memref<36x256xf32, #tpu.memory_space<vmem>>, vector<4x256xf32>,
    %c240_i32_42 = arith.constant 240 : i32
    %98 = tpu.dynamic_rotate %60 by %c240_i32_42 dim 1 : vector<4x256xf32>, i32 -> vector<4x256xf32>
    %99 = vector.extract_strided_slice %2 {offsets = [7, 0, 0], sizes = [1, 1, 256], strides = [1, 1, 1]} : vector<9x1x256xf32> to vector<1x1x256xf32>
    %100 = vector.shape_cast %99 : vector<1x1x256xf32> to vector<1x256xf32>
    %101 = vector.broadcast %100 : vector<1x256xf32> to vector<4x256xf32>
    %102 = arith.mulf %98, %101 : vector<4x256xf32>
    %c28_43 = arith.constant 28 : index
    %c0_44 = arith.constant 0 : index
    %103 = vector.load %arg8[%c28_43, %c0_44] : memref<36x256xf32, #tpu.memory_space<vmem>>, vector<4x256xf32>
    tpu.vector_store %arg8[%c28_43, %c0_44], %102 {strides = array<i32>} : memref<36x256xf32, #tpu.memory_space<vmem>>, vector<4x256xf32>,
    %c239_i32_45 = arith.constant 239 : i32
    %104 = tpu.dynamic_rotate %60 by %c239_i32_45 dim 1 : vector<4x256xf32>, i32 -> vector<4x256xf32>
    %105 = vector.extract_strided_slice %2 {offsets = [8, 0, 0], sizes = [1, 1, 256], strides = [1, 1, 1]} : vector<9x1x256xf32> to vector<1x1x256xf32>
    %106 = vector.shape_cast %105 : vector<1x1x256xf32> to vector<1x256xf32>
    %107 = vector.broadcast %106 : vector<1x256xf32> to vector<4x256xf32>
    %108 = arith.mulf %104, %107 : vector<4x256xf32>
    %c32_46 = arith.constant 32 : index
    %c0_47 = arith.constant 0 : index
    %109 = vector.load %arg8[%c32_46, %c0_47] : memref<36x256xf32, #tpu.memory_space<vmem>>, vector<4x256xf32>
    tpu.vector_store %arg8[%c32_46, %c0_47], %108 {strides = array<i32>} : memref<36x256xf32, #tpu.memory_space<vmem>>, vector<4x256xf32>,
    %c0_48 = arith.constant 0 : index
    %c0_49 = arith.constant 0 : index
    %110 = vector.load %arg8[%c0_48, %c0_49] : memref<36x256xf32, #tpu.memory_space<vmem>>, vector<36x256xf32>
    %111 = arith.truncf %110 : vector<36x256xf32> to vector<36x256xbf16>
    %c0_50 = arith.constant 0 : index
    %c0_51 = arith.constant 0 : index
    %112 = vector.load %arg4[%c0_50, %c0_51] : memref<4x36xbf16, #tpu.memory_space<vmem>>, vector<4x36xbf16>
    %cst_52 = arith.constant dense<0.000000e+00> : vector<4x256xf32>
    %113 = tpu.matmul %112, %111, %cst_52 {dimension_numbers = #tpu.dot_dimension_numbers<[1], [0], [0], [1], [0, 0, 1, 1], [], []>} : vector<4x36xbf16>, vector<36x256xbf16>, vector<4x256xf32> -> vector<4x256xf32>
    %c0_53 = arith.constant 0 : index
    %c0_54 = arith.constant 0 : index
    %114 = vector.load %arg5[%c0_53, %c0_54] : memref<4x1xf32, #tpu.memory_space<vmem>>, vector<4x1xf32>
    %115 = vector.broadcast %114 : vector<4x1xf32> to vector<4x256xf32>
    %116 = arith.addf %113, %115 : vector<4x256xf32>
    %117 = arith.addf %116, %1 : vector<4x256xf32>
    %cst_55 = arith.constant 0.000000e+00 : f32
    %118 = vector.broadcast %cst_55 : f32 to vector<4x256xf32>
    %119 = arith.maximumf %117, %118 : vector<4x256xf32>
    %c0_56 = arith.constant 0 : index
    %c0_57 = arith.constant 0 : index
    %c0_58 = arith.constant 0 : index
    %120 = vector.load %arg7[%c0_56, %c0_57, %c0_58] : memref<1x4x256xf32, #tpu.memory_space<vmem>>, vector<1x4x256xf32>
    %121 = vector.shape_cast %120 : vector<1x4x256xf32> to vector<4x256xf32>
    %122 = vector.shape_cast %119 : vector<4x256xf32> to vector<1x4x256xf32>
    tpu.vector_store %arg7[%c0_56, %c0_57, %c0_58], %122 {strides = array<i32>} : memref<1x4x256xf32, #tpu.memory_space<vmem>>, vector<1x4x256xf32>,
    return
  }
  func.func @transform_0(%arg0: i32) -> (i32, i32, i32) {
    %c0_i32 = arith.constant 0 : i32
    %c0_i32_0 = arith.constant 0 : i32
    %c0_i32_1 = arith.constant 0 : i32
    return %arg0, %c0_i32, %c0_i32_0 : i32, i32, i32
  }
  func.func @transform_1(%arg0: i32) -> (i32, i32) {
    %c0_i32 = arith.constant 0 : i32
    %c0_i32_0 = arith.constant 0 : i32
    %c0_i32_1 = arith.constant 0 : i32
    return %c0_i32, %c0_i32_0 : i32, i32
  }
  func.func @transform_2(%arg0: i32) -> (i32, i32) {
    %c0_i32 = arith.constant 0 : i32
    %c0_i32_0 = arith.constant 0 : i32
    %c0_i32_1 = arith.constant 0 : i32
    return %c0_i32, %c0_i32_0 : i32, i32
  }
  func.func @transform_3(%arg0: i32) -> (i32, i32) {
    %c0_i32 = arith.constant 0 : i32
    %c0_i32_0 = arith.constant 0 : i32
    %c0_i32_1 = arith.constant 0 : i32
    return %c0_i32, %c0_i32_0 : i32, i32
  }
  func.func @transform_4(%arg0: i32) -> (i32, i32) {
    %c0_i32 = arith.constant 0 : i32
    %c0_i32_0 = arith.constant 0 : i32
    %c0_i32_1 = arith.constant 0 : i32
    return %c0_i32, %c0_i32_0 : i32, i32
  }
  func.func @transform_5(%arg0: i32) -> (i32, i32, i32) {
    %c0_i32 = arith.constant 0 : i32
    %c0_i32_0 = arith.constant 0 : i32
    %c0_i32_1 = arith.constant 0 : i32
    %c0_i32_2 = arith.constant 0 : i32
    return %c0_i32, %c0_i32_0, %c0_i32_1 : i32, i32, i32
  }
  func.func @transform_6(%arg0: i32) -> (i32, i32, i32) {
    %c0_i32 = arith.constant 0 : i32
    %c0_i32_0 = arith.constant 0 : i32
    %c0_i32_1 = arith.constant 0 : i32
    return %arg0, %c0_i32, %c0_i32_0 : i32, i32, i32
  }
}

</mosaic_0001>

<bundles_post_ra>
// kernel: basic_block_forward.1
= control target key start
LH: loop header
LB: loop body
LE: loop exit
PB: predicated region body
PF: predicated region fallthrough
CT: control target
= control target key end

     0   :  { %s849_s21 = smov 0   ;;  %s1119_s0 = inlined_call_operand.vmem [shape: f32[2,4,256], index: 0, kind: input, shape index: {}]   ;;  %s1120_s1 = inlined_call_operand.vmem [shape: bf16[4,36], index: 1, kind: input, shape index: {}]   ;;  %s1121_s2 = inlined_call_operand.vmem [shape: f32[4,1], index: 2, kind: input, shape index: {}]   ;;  %s1122_s3 = inlined_call_operand.vmem [shape: bf16[4,36], index: 3, kind: input, shape index: {}]   ;;  %s1123_s4 = inlined_call_operand.vmem [shape: f32[4,1], index: 4, kind: input, shape index: {}]   ;;  %s1124_s5 = inlined_call_operand.vmem [shape: f32[9,1,256], index: 5, kind: input, shape index: {}]   ;;  %s1125_s6 = inlined_call_operand.vmem [shape: f32[2,4,256], index: 6, kind: output, shape index: {}]  }
   0x1 LB: > { %s761_s22 = sadd.s32 4294967295, %s803_s21   ;;  %p765_p0 = scmp.ge.s32.totalorder %s803_s21, 1  ;;  %s803_s21 = sphi %s849_s21, %s16_s21  }
   0x2   : > { %p212_p1 = scmp.lt.s32.totalorder %s803_s21, 3 }
   0x4   : > { %p213_p2 = pnand %p765_p0, %p212_p1 }
   0x5   : > { %p242_p3 = scmp.lt.s32.totalorder (!%p213_p2), %s761_s22, 1  ;;  %s805_s27 = smov (!%p213_p2), 16  }
   0x6   : > { %216 = sbr.rel (%p213_p2) target bundleno = 682 (0x2aa), region = 44  ;;  %s806_s28 = smov (!%p213_p2), 1  }
   0x7   : > { %s807_s29 = smov (!%p213_p2), 127   ;;  %s808_s30 = smov (!%p213_p2), 113  }
   0x8   : > { %s809_s7 = smov (!%p213_p2), 112   ;;  %s810_s8 = smov (!%p213_p2), 111  }
   0x9   : > { %s811_s9 = smov (!%p213_p2), 17   ;;  %s812_s10 = smov (!%p213_p2), 15  }
   0xb   : > { %s1127_s22 = smov (!%p242_p3, %s761_s22), 1  ;;  %v272_v19 = vlaneseq  ;;  %v886_v22 = vld [vmem:[%s1124_s5 + $0x2] sm:$0x3]  ;;  %v902_v32 = vld [vmem:[%s1124_s5 + $0x6] sm:$0x3]  ;;  %vm491_vm7 = vcmask 1041408  }
   0xc   : > { %s776_s23 = sshll.u32 %s1127_s22, 3  ;;  %v299_v24 = vperm.slane %v886_v22, 0  ;;  %v300_v25 = vperm.slane %v886_v22, 1  ;;  %v347_v33 = vperm.slane %v902_v32, 0  ;;  %v348_v34 = vperm.slane %v902_v32, 1 }
   0xd   : > { %s246_s26 = scalar_lea.vmem %s1119_s0, %s776_s23  ;;  %v881_v20 = vand.u32 127, %v272_v19  ;;  %v918_v44 = vld [vmem:[%s1124_s5 + $0xe] sm:$0x3]  ;;  %v934_v53 = vld [vmem:[%s1124_s5 + $0xa] sm:$0x3]  ;;  %vm487_vm9 = vcmask 293888  }
   0xe   : > { %v253_v0 = vld [vmem:[%s246_s26] sm:$0xff]  ;;  %v429_v45 = vperm.slane %v918_v44, 0  ;;  %v430_v46 = vperm.slane %v918_v44, 1  ;;  %v381_v56 = vperm.slane %v934_v53, 0  ;;  %v382_v57 = vperm.slane %v934_v53, 1 }
   0xf   : > { %263 = vst [vmem:[#allocation1] ss:$2 sm:$0xff] %v253_v0  ;;  %vm295_vm0 = vcmp.lt.s32.totalorder %v881_v20, 16  ;;  %vm343_vm1 = vcmp.lt.s32.totalorder %v881_v20, 1  ;;  %vm425_vm2 = vcmp.lt.s32.totalorder %v881_v20, 112  ;;  %vm377_vm3 = vcmp.lt.s32.totalorder %v881_v20, 127 }
  0x10   : > { %v950_v63 = vld [vmem:[%s1124_s5 + $0xc] sm:$0x3]  ;;  %vm404_vm4 = vcmp.lt.s32.totalorder %v881_v20, 113  ;;  %vm452_vm5 = vcmp.lt.s32.totalorder %v881_v20, 111  ;;  %v481_v19 = vld [vmem:[%s1121_s2] sm:$0xf] }
  0x11   : > { %vm274_vm6 = vcmp.lt.s32.totalorder %v881_v20, 17  ;;  %vm322_vm8 = vcmp.lt.s32.totalorder %v881_v20, 15  ;;  %vm702_vm10 = vcmask 1043456  }
  0x16   : > { %v264_v1 = vld.sshfl [vmem:[#allocation1] sm:$0xff pattern:$0x75316420]  ;;  %v265_v2 = vld.sshfl [vmem:[#allocation1 + $0x8] sm:$0xff pattern:$0x75316420] }
  0x17   : > { %286 = vst [vmem:[#allocation1] ss:$2 sm:$0xff] %v253_v0 }
  0x1e   : > { %v287_v3 = vld.sshfl [vmem:[#allocation1] sm:$0xff pattern:$0x75316420]  ;;  %v288_v4 = vld.sshfl [vmem:[#allocation1 + $0x8] sm:$0xff pattern:$0x75316420] }
  0x1f   : > { %313 = vst [vmem:[#allocation1] ss:$2 sm:$0xff] %v253_v0  ;;  %293 = vrot.lane.b32.xlu0 %v288_v4, %s805_s27  ;;  %291 = vrot.lane.b32.xlu2 %v287_v3, %s805_s27  ;;  %v409_v3 = vperm.slane %v950_v63, 1 }
  0x26   : > { %v314_v5 = vld.sshfl [vmem:[#allocation1] sm:$0xff pattern:$0x75316420]  ;;  %v315_v6 = vld.sshfl [vmem:[#allocation1 + $0x8] sm:$0xff pattern:$0x75316420] }
  0x27   : > { %334 = vst [vmem:[#allocation1] ss:$2 sm:$0xff] %v253_v0 }
  0x2e   : > { %v335_v7 = vld.sshfl [vmem:[#allocation1] sm:$0xff pattern:$0x75316420]  ;;  %v336_v8 = vld.sshfl [vmem:[#allocation1 + $0x8] sm:$0xff pattern:$0x75316420] }
  0x2f   : > { %339 = vrot.lane.b32.xlu1 %v335_v7, %s806_s28  ;;  %361 = vst [vmem:[#allocation1] ss:$2 sm:$0xff] %v253_v0  ;;  %341 = vrot.lane.b32.xlu2 %v336_v8, %s806_s28 }
  0x36   : > { %v362_v9 = vld.sshfl [vmem:[#allocation1] sm:$0xff pattern:$0x75316420]  ;;  %v363_v10 = vld.sshfl [vmem:[#allocation1 + $0x8] sm:$0xff pattern:$0x75316420] }
  0x37   : > { %366 = vst [vmem:[#allocation2 + $0x48] sm:$0xf] %v362_v9 }
  0x38   : > { %367 = vst [vmem:[#allocation2 + $0x28] sm:$0xf] %v363_v10 }
  0x39   : > { %368 = vst [vmem:[#allocation1] ss:$2 sm:$0xff] %v253_v0 }
  0x40   : > { %v369_v11 = vld.sshfl [vmem:[#allocation1] sm:$0xff pattern:$0x75316420]  ;;  %v370_v12 = vld.sshfl [vmem:[#allocation1 + $0x8] sm:$0xff pattern:$0x75316420] }
  0x41   : > { %373 = vrot.lane.b32.xlu1 %v369_v11, %s807_s29  ;;  %395 = vst [vmem:[#allocation1] ss:$2 sm:$0xff] %v253_v0  ;;  %v966_v11 = vld [vmem:[%s1124_s5 + $0x10] sm:$0x3] }
  0x48   : > { %v397_v13 = vld.sshfl [vmem:[#allocation1 + $0x8] sm:$0xff pattern:$0x75316420]  ;;  %v396_v14 = vld.sshfl [vmem:[#allocation1] sm:$0xff pattern:$0x75316420] }
  0x49   : > { %375 = vrot.lane.b32.xlu1 %v370_v12, %s807_s29  ;;  %400 = vrot.lane.b32.xlu0 %v396_v14, %s808_s30  ;;  %416 = vst [vmem:[#allocation1] ss:$2 sm:$0xff] %v253_v0  ;;  %v456_v12 = vperm.slane %v966_v11, 0 }
  0x50   : > { %v417_v15 = vld.sshfl [vmem:[#allocation1] sm:$0xff pattern:$0x75316420]  ;;  %v418_v16 = vld.sshfl [vmem:[#allocation1 + $0x8] sm:$0xff pattern:$0x75316420] }
  0x51   : > { %402 = vrot.lane.b32.xlu1 %v397_v13, %s808_s30  ;;  %443 = vst [vmem:[#allocation1] ss:$2 sm:$0xff] %v253_v0  ;;  %421 = vrot.lane.b32.xlu2 %v417_v15, %s809_s7  ;;  %v457_v13 = vperm.slane %v966_v11, 1 }
  0x58   : > { %v444_v17 = vld.sshfl [vmem:[#allocation1] sm:$0xff pattern:$0x75316420]  ;;  %v445_v18 = vld.sshfl [vmem:[#allocation1 + $0x8] sm:$0xff pattern:$0x75316420] }
  0x59   : > { %448 = vrot.lane.b32.xlu0 %v444_v17, %s810_s8  ;;  %690 = vst [vmem:[#allocation1] ss:$2 sm:$0xff] %v253_v0  ;;  %423 = vrot.lane.b32.xlu2 %v418_v16, %s809_s7 }
  0x5a   : > { %270 = vrot.lane.b32.xlu1 %v265_v2, %s811_s9  ;;  %v408_v2 = vperm.slane %v950_v63, 0 }
  0x61   : > { %450 = vrot.lane.b32.xlu0 %v445_v18, %s810_s8  ;;  %318 = vrot.lane.b32.xlu2 %v314_v5, %s812_s10 }
  0x69   : > { %268 = vrot.lane.b32.xlu0 %v264_v1, %s811_s9 }
  0x71   : > { %320 = vrot.lane.b32.xlu0 %v315_v6, %s812_s10 }
  0x79   : > { %v292_v21 = vpop.permute.xlu2 %291 }
  0x89   : > { %v342_v36 = vpop.permute.xlu2 %341 }
  0x91   : > { %v294_v23 = vpop.permute.xlu0 %293 }
  0x92   : > { %v296_v26 = vsel %vm295_vm0, %v292_v21, %v294_v23  ;;  %v297_v27 = vsel %vm295_vm0, %v294_v23, %v292_v21  ;;  %v985_v21 = vld [vmem:[%s1124_s5] sm:$0x3]  ;;  %v813_v23 = vmov 0  }
  0x93   : > { %v303_v28 = vmul.f32 %v299_v24, %v297_v27  ;;  %v304_v29 = vmul.f32 %v300_v25, %v296_v26  ;;  %795 = vset.pattern.permute.xlu1 %v813_v23  ;;  %796 = vset.pattern.permute.xlu0 %v813_v23  ;;  %v278_v27 = vperm.slane %v985_v21, 0 }
  0x94   : > { %484 = vperm.xlu1 %795, %v481_v19  }
  0x95   : > { %v307_v30 = vrot.slane %v303_v28, 4  ;;  %v308_v31 = vrot.slane %v304_v29, 4  ;;  %v279_v28 = vperm.slane %v985_v21, 1 }
  0x97   : > { %311 = vst [vmem:[#allocation2 + $0x30] sm:$0xf0] %v307_v30 }
  0x98   : > { %312 = vst [vmem:[#allocation2] sm:$0xf0] %v308_v31 }
  0xa1   : > { %v340_v35 = vpop.permute.xlu1 %339 }
  0xa2   : > { %v344_v37 = vsel %vm343_vm1, %v340_v35, %v342_v36  ;;  %v345_v38 = vsel %vm343_vm1, %v342_v36, %v340_v35 }
  0xa3   : > { %v351_v39 = vmul.f32 %v347_v33, %v345_v38  ;;  %v352_v40 = vmul.f32 %v348_v34, %v344_v37  ;;  %v1001_v38 = vld [vmem:[%s1124_s5 + $0x4] sm:$0x3] }
  0xa5   : > { %v355_v41 = vrot.slane %v351_v39, 4  ;;  %v356_v42 = vrot.slane %v352_v40, 4 }
  0xa7   : > { %359 = vst [vmem:[#allocation2 + $0x18] sm:$0xf0] %v355_v41 }
  0xa8   : > { %360 = vst [vmem:[#allocation2 + $0x10] sm:$0xf0] %v356_v42 }
  0xab   : > { %v422_v43 = vpop.permute.xlu2 %421 }
  0xb3   : > { %v374_v47 = vpop.permute.xlu1 %373  ;;  %v424_v48 = vpop.permute.xlu2 %423 }
  0xb4   : > { %v426_v49 = vsel %vm425_vm2, %v422_v43, %v424_v48  ;;  %v427_v50 = vsel %vm425_vm2, %v424_v48, %v422_v43  ;;  %v327_v48 = vperm.slane %v1001_v38, 1 }
  0xb5   : > { %v433_v51 = vmul.f32 %v429_v45, %v426_v49  ;;  %v434_v52 = vmul.f32 %v430_v46, %v427_v50 }
  0xb7   : > { %v437_v54 = vrot.slane %v433_v51, 4  ;;  %v438_v55 = vrot.slane %v434_v52, 4 }
  0xb9   : > { %441 = vst [vmem:[#allocation2 + $0x8] sm:$0xf0] %v437_v54 }
  0xba   : > { %442 = vst [vmem:[#allocation2 + $0x20] sm:$0xf0] %v438_v55 }
  0xbb   : > { %v376_v58 = vpop.permute.xlu1 %375  ;;  %v401_v4 = vpop.permute.xlu0 %400 }
  0xbc   : > { %v378_v59 = vsel %vm377_vm3, %v374_v47, %v376_v58  ;;  %v379_v60 = vsel %vm377_vm3, %v376_v58, %v374_v47  ;;  %v319_v43 = vpop.permute.xlu2 %318  ;;  %v326_v47 = vperm.slane %v1001_v38, 0 }
  0xbd   : > { %v385_v61 = vmul.f32 %v381_v56, %v378_v59  ;;  %v386_v62 = vmul.f32 %v382_v57, %v379_v60 }
  0xbf   : > { %v389_v0 = vrot.slane %v385_v61, 4  ;;  %v390_v1 = vrot.slane %v386_v62, 4 }
  0xc1   : > { %393 = vst [vmem:[#allocation2 + $0x48] sm:$0xf0] %v389_v0 }
  0xc2   : > { %394 = vst [vmem:[#allocation2 + $0x28] sm:$0xf0] %v390_v1 }
  0xc3   : > { %v403_v5 = vpop.permute.xlu1 %402 }
  0xc4   : > { %v405_v6 = vsel %vm404_vm4, %v401_v4, %v403_v5  ;;  %v406_v7 = vsel %vm404_vm4, %v403_v5, %v401_v4 }
  0xc5   : > { %v412_v8 = vmul.f32 %v408_v2, %v405_v6  ;;  %v413_v9 = vmul.f32 %v409_v3, %v406_v7 }
  0xc7   : > { %414 = vst [vmem:[#allocation2 + $0x8] sm:$0xf] %v412_v8 }
  0xc8   : > { %415 = vst [vmem:[#allocation2 + $0x20] sm:$0xf] %v413_v9  ;;  %v468_v49 = vld [vmem:[#allocation2 + $0x48] sm:$0xff]  ;;  %v480_v9 = vld [vmem:[%s1120_s1] sm:$0x3] }
  0xc9   : > { %v469_v52 = vld [vmem:[#allocation2 + $0x28] sm:$0xff] }
  0xcb   : > { %v449_v10 = vpop.permute.xlu0 %448 }
  0xcc   : > { %v271_v26 = vpop.permute.xlu1 %270 }
  0xce   : > { %v470_v50 = vld [vmem:[#allocation2 + $0x8] sm:$0xff] }
  0xcf   : > { %v471_v54 = vld [vmem:[#allocation2 + $0x20] sm:$0xff]  ;;  %v476_v60 = vpack.c.bf16 %v470_v50, %v468_v49 }
  0xd0   : > { %v477_v0 = vpack.c.bf16 %v471_v54, %v469_v52 }
  0xd3   : > { %v451_v14 = vpop.permute.xlu0 %450 }
  0xd4   : > { %v453_v15 = vsel %vm452_vm5, %v449_v10, %v451_v14  ;;  %v454_v16 = vsel %vm452_vm5, %v451_v14, %v449_v10 }
  0xd5   : > { %v460_v17 = vmul.f32 %v456_v12, %v453_v15  ;;  %v461_v18 = vmul.f32 %v457_v13, %v454_v16 }
  0xd7   : > { %462 = vst [vmem:[#allocation2 + $0x40] sm:$0xf] %v460_v17 }
  0xd8   : > { %463 = vst [vmem:[#allocation2 + $0x38] sm:$0xf] %v461_v18 }
  0xdb   : > { %v269_v29 = vpop.permute.xlu0 %268 }
  0xdc   : > { %v275_v30 = vsel %vm274_vm6, %v269_v29, %v271_v26  ;;  %v276_v31 = vsel %vm274_vm6, %v271_v26, %v269_v29 }
  0xdd   : > { %v282_v35 = vmul.f32 %v278_v27, %v276_v31  ;;  %v283_v36 = vmul.f32 %v279_v28, %v275_v30 }
  0xde   : > { %v472_v37 = vld [vmem:[#allocation2 + $0x40] sm:$0xf] }
  0xdf   : > { %284 = vst [vmem:[#allocation2 + $0x30] sm:$0xf] %v282_v35  ;;  %v478_v39 = vpack.c.bf16 %v472_v37, %v472_v37  ;;  %v473_v40 = vld [vmem:[#allocation2 + $0x38] sm:$0xf] }
  0xe0   : > { %285 = vst [vmem:[#allocation2] sm:$0xf] %v283_v36  ;;  %v479_v41 = vpack.c.bf16 %v473_v40, %v473_v40 }
  0xe1   : > { %v493_v42 = vsel %vm491_vm7, %v478_v39, 0 }
  0xe2   : > { %503 = vmatpush.bf16.msra.mxu0 %v493_v42  ;;  %v496_v51 = vsel %vm491_vm7, %v479_v41, 0 }
  0xe3   : > { %516 = vmatpush.bf16.msra.mxu1 %v496_v51  ;;  %v321_v55 = vpop.permute.xlu0 %320 }
  0xe4   : > { %v323_v58 = vsel %vm322_vm8, %v319_v43, %v321_v55  ;;  %v324_v59 = vsel %vm322_vm8, %v321_v55, %v319_v43 }
  0xe5   : > { %v330_v61 = vmul.f32 %v326_v47, %v324_v59  ;;  %v331_v62 = vmul.f32 %v327_v48, %v323_v58 }
  0xe6   : > { %504 = vmatpush.bf16.msra.mxu0 %v476_v60  ;;  %v464_v1 = vld [vmem:[#allocation2 + $0x30] sm:$0xff] }
  0xe7   : > { %332 = vst [vmem:[#allocation2 + $0x18] sm:$0xf] %v330_v61  ;;  %517 = vmatpush.bf16.msra.mxu1 %v477_v0  ;;  %v465_v6 = vld [vmem:[#allocation2] sm:$0xff] }
  0xe8   : > { %333 = vst [vmem:[#allocation2 + $0x10] sm:$0xf] %v331_v62 }
  0xee   : > { %v466_v4 = vld [vmem:[#allocation2 + $0x18] sm:$0xff] }
  0xef   : > { %v474_v5 = vpack.c.bf16 %v466_v4, %v464_v1  ;;  %v467_v7 = vld [vmem:[#allocation2 + $0x10] sm:$0xff] }
  0xf0   : > { %v475_v8 = vpack.c.bf16 %v467_v7, %v465_v6 }
  0xf1   : > { %505 = vmatpush.bf16.msra.mxu0 %v474_v5 }
  0xf2   : > { %518 = vmatpush.bf16.msra.mxu1 %v475_v8 }
  0xf4   : > { %770 = vmatmul.msk.bf16.vlgmr.msra.gmra.mxu0 %vm487_vm9, %v480_v9 }
  0xf5   : > { %771 = vmatmul.msk.bf16.vlgmr.msra.gmra.mxu1 %vm487_vm9, %v480_v9 }
 0x106   : > { %v485_v10 = vpop.permute.xlu1 %484 }
 0x171   : > { %v507_v14 = vpop.f32.mrf.mxu0 }
 0x172   : > { %v508_v15 = vadd.f32 %v507_v14, %v485_v10  ;;  %v520_v16 = vpop.f32.mrf.mxu1 }
 0x173   : > { %v521_v17 = vadd.f32 %v520_v16, %v485_v10  ;;  %v649_v16 = vld [vmem:[%s1123_s4] sm:$0xf] }
 0x174   : > { %v524_v18 = vmax.f32 %v508_v15, 0.0 }
 0x175   : > { %v525_v19 = vmax.f32 %v521_v17, 0.0 }
 0x176   : > { %578 = vst [vmem:[#allocation2 + $0x48] sm:$0xf] %v524_v18  ;;  %580 = vrot.lane.b32.xlu1 %v524_v18, %s807_s29  ;;  %622 = vrot.lane.b32.xlu2 %v524_v18, %s810_s8 }
 0x177   : > { %579 = vst [vmem:[#allocation2 + $0x28] sm:$0xf] %v525_v19  ;;  %624 = vrot.lane.b32.xlu0 %v525_v19, %s810_s8 }
 0x179   : > { %v509_v23 = vpop.f32.mrf.mxu0 }
 0x17a   : > { %v522_v26 = vpop.f32.mrf.mxu1 }
 0x17e   : > { %608 = vrot.lane.b32.xlu1 %v525_v19, %s809_s7  ;;  %582 = vrot.lane.b32.xlu2 %v525_v19, %s807_s29 }
 0x17f   : > { %606 = vrot.lane.b32.xlu0 %v524_v18, %s809_s7 }
 0x186   : > { %536 = vrot.lane.b32.xlu1 %v524_v18, %s805_s27  ;;  %596 = vrot.lane.b32.xlu2 %v524_v18, %s808_s30 }
 0x187   : > { %598 = vrot.lane.b32.xlu0 %v525_v19, %s808_s30 }
 0x18e   : > { %564 = vrot.lane.b32.xlu1 %v525_v19, %s806_s28  ;;  %538 = vrot.lane.b32.xlu2 %v525_v19, %s805_s27 }
 0x18f   : > { %562 = vrot.lane.b32.xlu0 %v524_v18, %s806_s28 }
 0x196   : > { %552 = vrot.lane.b32.xlu1 %v524_v18, %s812_s10  ;;  %526 = vrot.lane.b32.xlu2 %v524_v18, %s811_s9 }
 0x197   : > { %528 = vrot.lane.b32.xlu0 %v525_v19, %s811_s9  ;;  %s251_s9 = scalar_lea.vmem %s1125_s6, %s776_s23 }
 0x19e   : > { %554 = vrot.lane.b32.xlu2 %v525_v19, %s812_s10 }
 0x19f   : > { %652 = vperm.xlu0 %796, %v649_v16  }
 0x1d0   : > { %v623_v29 = vpop.permute.xlu2 %622 }
 0x1d8   : > { %v583_v30 = vpop.permute.xlu2 %582 }
 0x1e0   : > { %v597_v39 = vpop.permute.xlu2 %596 }
 0x1e8   : > { %v581_v31 = vpop.permute.xlu1 %580 }
 0x1e9   : > { %v625_v35 = vpop.permute.xlu0 %624  ;;  %v584_v36 = vsel %vm377_vm3, %v581_v31, %v583_v30  ;;  %v585_v37 = vsel %vm377_vm3, %v583_v30, %v581_v31 }
 0x1ea   : > { %v626_v40 = vsel %vm452_vm5, %v623_v29, %v625_v35  ;;  %v627_v41 = vsel %vm452_vm5, %v625_v35, %v623_v29  ;;  %v586_v42 = vmul.f32 %v584_v36, %v381_v56  ;;  %v587_v43 = vmul.f32 %v585_v37, %v382_v57 }
 0x1eb   : > { %v628_v49 = vmul.f32 %v626_v40, %v456_v12  ;;  %v629_v50 = vmul.f32 %v627_v41, %v457_v13  ;;  %v539_v12 = vpop.permute.xlu2 %538 }
 0x1ec   : > { %v590_v51 = vrot.slane %v586_v42, 4  ;;  %v591_v52 = vrot.slane %v587_v43, 4 }
 0x1ed   : > { %630 = vst [vmem:[#allocation2 + $0x40] sm:$0xf] %v628_v49 }
 0x1ee   : > { %631 = vst [vmem:[#allocation2 + $0x38] sm:$0xf] %v629_v50 }
 0x1ef   : > { %594 = vst [vmem:[#allocation2 + $0x48] sm:$0xf0] %v590_v51 }
 0x1f0   : > { %595 = vst [vmem:[#allocation2 + $0x28] sm:$0xf0] %v591_v52  ;;  %v609_v54 = vpop.permute.xlu1 %608 }
 0x1f1   : > { %v607_v55 = vpop.permute.xlu0 %606 }
 0x1f2   : > { %v610_v56 = vsel %vm425_vm2, %v607_v55, %v609_v54  ;;  %v611_v53 = vsel %vm425_vm2, %v609_v54, %v607_v55 }
 0x1f3   : > { %v612_v57 = vmul.f32 %v610_v56, %v429_v45  ;;  %v613_v11 = vmul.f32 %v611_v53, %v430_v46  ;;  %v527_v17 = vpop.permute.xlu2 %526  ;;  %v692_v56 = vld.sshfl [vmem:[#allocation1 + $0x8] sm:$0xff pattern:$0x75316420] }
 0x1f4   : > { %v640_v13 = vld [vmem:[#allocation2 + $0x40] sm:$0xf] }
 0x1f5   : > { %v616_v58 = vrot.slane %v612_v57, 4  ;;  %v617_v59 = vrot.slane %v613_v11, 4  ;;  %v646_v60 = vpack.c.bf16 %v640_v13, %v640_v13  ;;  %v641_v61 = vld [vmem:[#allocation2 + $0x38] sm:$0xf] }
 0x1f6   : > { %v647_v62 = vpack.c.bf16 %v641_v61, %v641_v61  ;;  %v636_v18 = vld [vmem:[#allocation2 + $0x48] sm:$0xff] }
 0x1f7   : > { %620 = vst [vmem:[#allocation2 + $0x8] sm:$0xf0] %v616_v58  ;;  %v659_v0 = vsel %vm491_vm7, %v646_v60, 0  ;;  %v637_v30 = vld [vmem:[#allocation2 + $0x28] sm:$0xff] }
 0x1f8   : > { %621 = vst [vmem:[#allocation2 + $0x20] sm:$0xf0] %v617_v59  ;;  %669 = vmatpush.bf16.msra.mxu2 %v659_v0  ;;  %v662_v1 = vsel %vm491_vm7, %v647_v62, 0  ;;  %v537_v4 = vpop.permute.xlu1 %536 }
 0x1f9   : > { %682 = vmatpush.bf16.msra.mxu3 %v662_v1  ;;  %v599_v45 = vpop.permute.xlu0 %598  ;;  %v540_v44 = vsel %vm295_vm0, %v537_v4, %v539_v12  ;;  %v541_v46 = vsel %vm295_vm0, %v539_v12, %v537_v4 }
 0x1fa   : > { %v600_v5 = vsel %vm404_vm4, %v597_v39, %v599_v45  ;;  %v601_v6 = vsel %vm404_vm4, %v599_v45, %v597_v39  ;;  %v542_v7 = vmul.f32 %v541_v46, %v299_v24  ;;  %v543_v8 = vmul.f32 %v540_v44, %v300_v25 }
 0x1fb   : > { %v602_v9 = vmul.f32 %v600_v5, %v408_v2  ;;  %v603_v10 = vmul.f32 %v601_v6, %v409_v3  ;;  %v555_v36 = vpop.permute.xlu2 %554 }
 0x1fc   : > { %v546_v14 = vrot.slane %v542_v7, 4  ;;  %v547_v15 = vrot.slane %v543_v8, 4 }
 0x1fd   : > { %604 = vst [vmem:[#allocation2 + $0x8] sm:$0xf] %v602_v9 }
 0x1fe   : > { %605 = vst [vmem:[#allocation2 + $0x20] sm:$0xf] %v603_v10 }
 0x1ff   : > { %550 = vst [vmem:[#allocation2 + $0x30] sm:$0xf0] %v546_v14 }
 0x200   : > { %551 = vst [vmem:[#allocation2] sm:$0xf0] %v547_v15  ;;  %v565_v22 = vpop.permute.xlu1 %564 }
 0x201   : > { %v563_v24 = vpop.permute.xlu0 %562 }
 0x202   : > { %v566_v25 = vsel %vm343_vm1, %v563_v24, %v565_v22  ;;  %v567_v63 = vsel %vm343_vm1, %v565_v22, %v563_v24 }
 0x203   : > { %v568_v2 = vmul.f32 %v567_v63, %v347_v33  ;;  %v569_v3 = vmul.f32 %v566_v25, %v348_v34 }
 0x204   : > { %v638_v19 = vld [vmem:[#allocation2 + $0x8] sm:$0xff] }
 0x205   : > { %v572_v23 = vrot.slane %v568_v2, 4  ;;  %v573_v26 = vrot.slane %v569_v3, 4  ;;  %v644_v29 = vpack.c.bf16 %v638_v19, %v636_v18  ;;  %v639_v31 = vld [vmem:[#allocation2 + $0x20] sm:$0xff] }
 0x206   : > { %v645_v35 = vpack.c.bf16 %v639_v31, %v637_v30 }
 0x207   : > { %576 = vst [vmem:[#allocation2 + $0x18] sm:$0xf0] %v572_v23  ;;  %670 = vmatpush.bf16.msra.mxu2 %v644_v29 }
 0x208   : > { %577 = vst [vmem:[#allocation2 + $0x10] sm:$0xf0] %v573_v26  ;;  %683 = vmatpush.bf16.msra.mxu3 %v645_v35  ;;  %v553_v37 = vpop.permute.xlu1 %552 }
 0x209   : > { %v529_v39 = vpop.permute.xlu0 %528  ;;  %v556_v33 = vsel %vm322_vm8, %v553_v37, %v555_v36  ;;  %v557_v32 = vsel %vm322_vm8, %v555_v36, %v553_v37 }
 0x20a   : > { %v530_v34 = vsel %vm274_vm6, %v527_v17, %v529_v39  ;;  %v531_v40 = vsel %vm274_vm6, %v529_v39, %v527_v17  ;;  %v558_v41 = vmul.f32 %v557_v32, %v326_v47  ;;  %v559_v49 = vmul.f32 %v556_v33, %v327_v48  ;;  %v691_v48 = vld.sshfl [vmem:[#allocation1] sm:$0xff pattern:$0x75316420] }
 0x20b   : > { %v532_v42 = vmul.f32 %v531_v40, %v278_v27  ;;  %v533_v43 = vmul.f32 %v530_v34, %v279_v28  ;;  %v648_v27 = vld [vmem:[%s1122_s3] sm:$0x3] }
 0x20c   : > { %560 = vst [vmem:[#allocation2 + $0x18] sm:$0xf] %v558_v41 }
 0x20d   : > { %534 = vst [vmem:[#allocation2 + $0x30] sm:$0xf] %v532_v42 }
 0x20e   : > { %535 = vst [vmem:[#allocation2] sm:$0xf] %v533_v43 }
 0x20f   : > { %561 = vst [vmem:[#allocation2 + $0x10] sm:$0xf] %v559_v49 }
 0x211   : > { %v653_v21 = vpop.permute.xlu0 %652 }
 0x213   : > { %v634_v50 = vld [vmem:[#allocation2 + $0x18] sm:$0xff] }
 0x214   : > { %v632_v51 = vld [vmem:[#allocation2 + $0x30] sm:$0xff] }
 0x215   : > { %v642_v20 = vpack.c.bf16 %v634_v50, %v632_v51  ;;  %v633_v52 = vld [vmem:[#allocation2] sm:$0xff] }
 0x216   : > { %v635_v54 = vld [vmem:[#allocation2 + $0x10] sm:$0xff] }
 0x217   : > { %671 = vmatpush.bf16.msra.mxu2 %v642_v20  ;;  %v643_v47 = vpack.c.bf16 %v635_v54, %v633_v52 }
 0x219   : > { %684 = vmatpush.bf16.msra.mxu3 %v643_v47 }
 0x21a   : > { %772 = vmatmul.msk.bf16.vlgmr.msra.gmra.mxu2 %vm487_vm9, %v648_v27 }
 0x21c   : > { %773 = vmatmul.msk.bf16.vlgmr.msra.gmra.mxu3 %vm487_vm9, %v648_v27 }
 0x29d   : > { %v673_v28 = vpop.f32.mrf.mxu2 }
 0x29e   : > { %v674_v38 = vadd.f32 %v673_v28, %v653_v21 }
 0x29f   : > { %v686_v55 = vpop.f32.mrf.mxu3 }
 0x2a0   : > { %v687_v53 = vadd.f32 %v686_v55, %v653_v21  ;;  %v695_v57 = vadd.f32 %v691_v48, %v674_v38 }
 0x2a2   : > { %v696_v11 = vadd.f32 %v692_v56, %v687_v53  ;;  %v697_v58 = vmax.f32 %v695_v57, 0.0 }
 0x2a4   : > { %v698_v12 = vmax.f32 %v696_v11, 0.0 }
 0x2a5   : > { %v675_v13 = vpop.f32.mrf.mxu2 }
 0x2a6   : > { %v701_v59 = vrot.slane %v698_v12, 4 }
 0x2a7   : > { %v688_v60 = vpop.f32.mrf.mxu3 }
 0x2a8   : > { %v703_v61 = vsel %vm702_vm10, %v697_v58, %v701_v59 }
 0x2a9   : > { %705 = vst [vmem:[%s251_s9] sm:$0xff] %v703_v61 }
 0x2aa PF: > { %s16_s21 = sadd.s32 1, %s803_s21  }
 0x2ab   : > { %p13_p4 = scmp.ge.s32.totalorder %s16_s21, 4  }
 0x2ad   :  { %15 = sbr.rel (!%p13_p4) target bundleno = 1 (0x1), region = 74 }

</bundles_post_ra>
